<compile_context>
chip_gen: v6e
topology: v6e:2x2x1
jax: 0.10.0
libtpu: 0.0.40
codegen_flags: <defaults>
</compile_context>

<pallas_src>
import numpy as np
import jax
import jax.numpy as jnp
from jax.experimental import pallas as pl
from jax.experimental.pallas import tpu as pltpu

IGNORE_INDEX = -100  # nn.CrossEntropyLoss default / pad_sequence padding_value
ROW_ALIGN = 16       # bf16 sublane packing: row-tile must be a multiple of 16


def _round_up(x, m):
    return ((x + m - 1) // m) * m


# ----------------------------------------------------------------------------
# Pallas kernel: linear classifier + cross-entropy partials + argmax (one tile)
# ----------------------------------------------------------------------------
def pronscor_kernel(feat_ref, w_ref, b_ref, label_ref, sum_ref, cnt_ref, pred_ref):
    feats = feat_ref[...]                                   # (TILE_N, D) bf16
    w = w_ref[...]                                          # (D, C)      bf16
    b = b_ref[...]                                          # (1, C)      f32

    # frame-wise linear classifier: bf16 x bf16 -> f32 accumulation on the MXU
    logits = jnp.dot(feats, w, preferred_element_type=jnp.float32) + b   # (TILE_N, C)
    C = logits.shape[-1]

    # single row-max, reused by log-softmax AND argmax (one fewer XLU pass)
    m = jnp.max(logits, axis=-1, keepdims=True)                          # (TILE_N, 1)
    lse = jnp.log(jnp.sum(jnp.exp(logits - m), axis=-1, keepdims=True)) + m

    labels = label_ref[...]                                              # (TILE_N, 1) i32
    class_ids = jax.lax.broadcasted_iota(jnp.int32, logits.shape, 1)     # (TILE_N, C)

    # gather the target logit with a one-hot select (label==-100 -> all zeros)
    tgt_logit = jnp.sum(jnp.where(class_ids == labels, logits, 0.0),
                        axis=-1, keepdims=True)                          # (TILE_N, 1)

    valid = (labels != IGNORE_INDEX).astype(jnp.float32)                 # (TILE_N, 1)
    per_token_loss = (lse - tgt_logit) * valid                           # (TILE_N, 1)

    # per-tile partial sums; the JAX wrapper reduces them (keeps axis "parallel")
    loss_sum = jnp.sum(per_token_loss, axis=0, keepdims=True)            # (1, 1)
    count = jnp.sum(valid, axis=0, keepdims=True)                        # (1, 1)
    sum_ref[...] = jnp.broadcast_to(loss_sum.reshape(1, 1, 1), sum_ref.shape)
    cnt_ref[...] = jnp.broadcast_to(count.reshape(1, 1, 1), cnt_ref.shape)

    # argmax over classes (first max index, matching torch .max(dim=-1).indices)
    idx = jnp.where(logits == m, class_ids, jnp.int32(C))
    pred_ref[...] = jnp.min(idx, axis=-1, keepdims=True).astype(jnp.int32)


def pronscor_model_forward(features, labels, w, b, tile_n=1024):
    """features: (B, T, D) f32, labels: (B, T) int -> (loss scalar, pred (B, T))."""
    B, T, D = features.shape
    C = w.shape[1]
    N = B * T

    TILE_N = min(_round_up(tile_n, ROW_ALIGN), _round_up(N, ROW_ALIGN))
    N_pad = _round_up(N, TILE_N)
    num_tiles = N_pad // TILE_N

    # bf16 feature stream straight into the MXU (kernel accumulates in f32)
    feat2d = features.reshape(N, D).astype(jnp.bfloat16)
    feat2d = jnp.pad(feat2d, ((0, N_pad - N), (0, 0)))
    lab2d = labels.reshape(N, 1).astype(jnp.int32)
    lab2d = jnp.pad(lab2d, ((0, N_pad - N), (0, 0)),
                    constant_values=IGNORE_INDEX)            # padded rows -> ignored
    w_bf = w.astype(jnp.bfloat16)
    b2d = b.reshape(1, C).astype(jnp.float32)

    # NOTE: tiles here are small; for very large D*TILE_N raise vmem_limit_bytes
    # via pltpu.CompilerParams (v5e scoped default is only 16 MiB).
    sums, cnts, pred = pl.pallas_call(
        pronscor_kernel,
        grid=(num_tiles,),
        in_specs=[
            pl.BlockSpec((TILE_N, D), lambda i: (i, 0)),      # feature tile (pipelined)
            pl.BlockSpec((D, C), lambda i: (0, 0)),           # weight, resident
            pl.BlockSpec((1, C), lambda i: (0, 0)),           # bias, resident
            pl.BlockSpec((TILE_N, 1), lambda i: (i, 0)),      # labels tile
        ],
        out_specs=(
            pl.BlockSpec((1, 1, 128), lambda i: (i, 0, 0)),   # per-tile loss sum
            pl.BlockSpec((1, 1, 128), lambda i: (i, 0, 0)),   # per-tile valid count
            pl.BlockSpec((TILE_N, 1), lambda i: (i, 0)),      # per-frame argmax
        ),
        out_shape=(
            jax.ShapeDtypeStruct((num_tiles, 1, 128), jnp.float32),
            jax.ShapeDtypeStruct((num_tiles, 1, 128), jnp.float32),
            jax.ShapeDtypeStruct((N_pad, 1), jnp.int32),
        ),
        compiler_params=pltpu.CompilerParams(
            dimension_semantics=("parallel",)),               # v7x: shard across 2 TCs
    )(feat2d, w_bf, b2d, lab2d)

    # final reduction of tiny per-tile partials in JAX
    # (matches torch: 0/0 -> NaN if every label is -100)
    loss = jnp.sum(sums[:, 0, 0]) / jnp.sum(cnts[:, 0, 0])
    return loss, pred[:N, 0].reshape(B, T)


# ----------------------------------------------------------------------------
# Plain-JAX / host glue reproducing DownstreamExpert.forward's preprocessing
# ----------------------------------------------------------------------------
def pad_sequence_np(seqs, pad_value=0.0):
    max_len = max(s.shape[0] for s in seqs)
    out = []
    for s in seqs:
        pad_width = [(0, max_len - s.shape[0])] + [(0, 0)] * (s.ndim - 1)
        out.append(np.pad(s, pad_width, constant_values=pad_value))
    return np.stack(out, axis=0)


def match_length(inputs, label_len):
    """JAX equivalent of DownstreamExpert._match_length (static shapes)."""
    _, input_len, _ = inputs.shape
    factor = int(round(label_len / input_len))
    if factor > 1:
        inputs = jnp.repeat(inputs, factor, axis=1)   # repeat each frame `factor` times
        input_len = inputs.shape[1]
    if input_len > label_len:
        inputs = inputs[:, :label_len, :]
    elif input_len < label_len:
        pad_vec = inputs[:, -1:, :]
        pad = jnp.tile(pad_vec, (1, label_len - input_len, 1))
        inputs = jnp.concatenate([inputs, pad], axis=1)
    return inputs


def downstream_expert_forward(feature_list, label_list, w, b):
    """Mirrors DownstreamExpert.forward(split, features, labels, records)."""
    lengths = np.array([len(l) for l in label_list], dtype=np.int64)
    features = jnp.asarray(pad_sequence_np(feature_list, 0.0), dtype=jnp.float32)
    labels = jnp.asarray(pad_sequence_np(label_list, IGNORE_INDEX), dtype=jnp.int32)
    features = match_length(features, labels.shape[-1])

    loss, pred = pronscor_model_forward(features, labels, w, b)

    # records bookkeeping (host side, same as the torch code's python loop)
    records = {"acc": [], "sample_wise_metric": []}
    pred_np = np.asarray(pred)
    lab_np = np.asarray(labels)
    for s_row, l in zip(pred_np == lab_np, lengths):
        utter_result = s_row[:l].tolist()
        records["acc"] += utter_result
        records["sample_wise_metric"].append(float(np.mean(utter_result)))
    return loss, pred, records


# ----------------------------------------------------------------------------
# Reference (pure numpy, f64) for verification
# ----------------------------------------------------------------------------
def reference_loss(features, labels, w, b):
    feats = np.asarray(features).reshape(-1, features.shape[-1]).astype(np.float64)
    labs = np.asarray(labels).reshape(-1)
    logits = feats @ np.asarray(w, np.float64) + np.asarray(b, np.float64)
    m = logits.max(-1, keepdims=True)
    lse = np.log(np.exp(logits - m).sum(-1, keepdims=True)) + m
    valid = labs != IGNORE_INDEX
    tgt = logits[np.arange(len(labs)), np.where(valid, labs, 0)]
    per = (lse[:, 0] - tgt) * valid
    return per.sum() / valid.sum(), logits.argmax(-1).reshape(labels.shape)


if __name__ == "__main__":
    # Small, module-consistent shapes: upstream_dim D=32, class_num C=48,
    # batch B=2, variable sequence lengths.
    D, C = 32, 48
    key = jax.random.PRNGKey(0)
    k_w, k_f1, k_f2, k_l1, k_l2 = jax.random.split(key, 5)

    # deterministic synthetic "model" parameters (phone-linear classifier)
    w = 0.02 * jax.random.normal(k_w, (D, C), dtype=jnp.float32)
    b = jnp.zeros((C,), dtype=jnp.float32)

    # unpadded upstream features (variable length) and frame-wise labels
    feat_list = [
        np.asarray(jax.random.normal(k_f1, (24, D), dtype=jnp.float32)),
        np.asarray(jax.random.normal(k_f2, (18, D), dtype=jnp.float32)),
    ]
    label_list = [
        np.asarray(jax.random.randint(k_l1, (23,), 0, C, dtype=jnp.int32)),
        np.asarray(jax.random.randint(k_l2, (17,), 0, C, dtype=jnp.int32)),
    ]

    loss, pred, records = downstream_expert_forward(feat_list, label_list, w, b)
    loss = jax.block_until_ready(loss)
    pred = jax.block_until_ready(pred)

    # verify against an f64 numpy reference using the SAME bf16-rounded operands
    labels_padded = pad_sequence_np(label_list, IGNORE_INDEX).astype(np.int32)
    features_padded = match_length(
        jnp.asarray(pad_sequence_np(feat_list, 0.0), jnp.float32),
        labels_padded.shape[-1])
    feats_r = np.asarray(features_padded.astype(jnp.bfloat16).astype(jnp.float32))
    w_r = np.asarray(w.astype(jnp.bfloat16).astype(jnp.float32))
    ref_loss, ref_pred = reference_loss(feats_r, labels_padded, w_r, np.asarray(b))
    np.testing.assert_allclose(float(loss), float(ref_loss), rtol=1e-4, atol=1e-5)
    np.testing.assert_array_equal(np.asarray(pred), ref_pred)

    # exercise the multi-tile / parallel-grid path explicitly (3 tiles of 16 rows)
    loss2, pred2 = pronscor_model_forward(
        features_padded, jnp.asarray(labels_padded), w, b, tile_n=16)
    loss2 = jax.block_until_ready(loss2)
    np.testing.assert_allclose(float(loss2), float(ref_loss), rtol=1e-4, atol=1e-5)
    np.testing.assert_array_equal(np.asarray(pred2), ref_pred)

    print("KERNEL_OK")
</pallas_src>

<mosaic_0001>
module attributes {stable_mosaic.version = 11 : i64} {
  func.func @pronscor_kernel(%arg0: i32, %arg1: memref<48x32xbf16, #tpu.memory_space<vmem>>, %arg2: memref<32x48xbf16, #tpu.memory_space<vmem>>, %arg3: memref<1x48xf32, #tpu.memory_space<vmem>>, %arg4: memref<48x1xi32, #tpu.memory_space<vmem>>, %arg5: memref<1x1x128xf32, #tpu.memory_space<vmem>>, %arg6: memref<1x1x128xf32, #tpu.memory_space<vmem>>, %arg7: memref<48x1xi32, #tpu.memory_space<vmem>>) attributes {dimension_semantics = [#tpu.dimension_semantics<parallel>], iteration_bounds = array<i64: 1>, scalar_prefetch = 0 : i64, scratch_operands = 0 : i64, tpu.core_type = #tpu.core_type<tc>, window_params = [{transform_indices = @transform_0, window_bounds = array<i64: 48, 32>}, {pipeline_mode = #tpu.pipeline_mode<synchronous>, transform_indices = @transform_1, window_bounds = array<i64: 32, 48>}, {pipeline_mode = #tpu.pipeline_mode<synchronous>, transform_indices = @transform_2, window_bounds = array<i64: 1, 48>}, {transform_indices = @transform_3, window_bounds = array<i64: 48, 1>}, {transform_indices = @transform_4, window_bounds = array<i64: 1, 1, 128>}, {transform_indices = @transform_5, window_bounds = array<i64: 1, 1, 128>}, {transform_indices = @transform_6, window_bounds = array<i64: 48, 1>}]} {
    %c0 = arith.constant 0 : index
    %c0_0 = arith.constant 0 : index
    %0 = vector.load %arg1[%c0, %c0_0] : memref<48x32xbf16, #tpu.memory_space<vmem>>, vector<48x32xbf16>
    %c0_1 = arith.constant 0 : index
    %c0_2 = arith.constant 0 : index
    %1 = vector.load %arg2[%c0_1, %c0_2] : memref<32x48xbf16, #tpu.memory_space<vmem>>, vector<32x48xbf16>
    %c0_3 = arith.constant 0 : index
    %c0_4 = arith.constant 0 : index
    %2 = vector.load %arg3[%c0_3, %c0_4] : memref<1x48xf32, #tpu.memory_space<vmem>>, vector<1x48xf32>
    %cst = arith.constant dense<0.000000e+00> : vector<48x48xf32>
    %3 = tpu.matmul %0, %1, %cst {dimension_numbers = #tpu.dot_dimension_numbers<[1], [0], [0], [1], [0, 0, 1, 1], [], []>} : vector<48x32xbf16>, vector<32x48xbf16>, vector<48x48xf32> -> vector<48x48xf32>
    %4 = vector.broadcast %2 : vector<1x48xf32> to vector<48x48xf32>
    %5 = arith.addf %3, %4 : vector<48x48xf32>
    %cst_5 = arith.constant dense<0xFF800000> : vector<48xf32>
    %6 = vector.multi_reduction <maximumf>, %5, %cst_5 [1] : vector<48x48xf32> to vector<48xf32>
    %7 = vector.shape_cast %6 : vector<48xf32> to vector<48x1xf32>
    %8 = vector.broadcast %7 : vector<48x1xf32> to vector<48x48xf32>
    %9 = arith.subf %5, %8 : vector<48x48xf32>
    %10 = math.exp %9 : vector<48x48xf32>
    %cst_6 = arith.constant dense<0.000000e+00> : vector<48xf32>
    %11 = vector.multi_reduction <add>, %10, %cst_6 [1] : vector<48x48xf32> to vector<48xf32>
    %12 = vector.shape_cast %11 : vector<48xf32> to vector<48x1xf32>
    %13 = math.log %12 : vector<48x1xf32>
    %14 = arith.addf %13, %7 : vector<48x1xf32>
    %c0_7 = arith.constant 0 : index
    %c0_8 = arith.constant 0 : index
    %15 = vector.load %arg4[%c0_7, %c0_8] : memref<48x1xi32, #tpu.memory_space<vmem>>, vector<48x1xi32>
    %16 = tpu.iota {dimensions = array<i32: 1>} : vector<48x48xi32>
    %17 = vector.broadcast %15 : vector<48x1xi32> to vector<48x48xi32>
    %18 = arith.cmpi eq, %16, %17 : vector<48x48xi32>
    %cst_9 = arith.constant 0.000000e+00 : f32
    %19 = vector.broadcast %cst_9 : f32 to vector<48x48xf32>
    %20 = arith.select %18, %5, %19 : vector<48x48xi1>, vector<48x48xf32>
    %cst_10 = arith.constant dense<0.000000e+00> : vector<48xf32>
    %21 = vector.multi_reduction <add>, %20, %cst_10 [1] : vector<48x48xf32> to vector<48xf32>
    %22 = vector.shape_cast %21 : vector<48xf32> to vector<48x1xf32>
    %c-100_i32 = arith.constant -100 : i32
    %23 = vector.broadcast %c-100_i32 : i32 to vector<48x1xi32>
    %24 = arith.cmpi ne, %15, %23 : vector<48x1xi32>
    %25 = arith.extui %24 : vector<48x1xi1> to vector<48x1xi32>
    %26 = arith.sitofp %25 : vector<48x1xi32> to vector<48x1xf32>
    %27 = arith.subf %14, %22 : vector<48x1xf32>
    %28 = arith.mulf %27, %26 : vector<48x1xf32>
    %cst_11 = arith.constant dense<0.000000e+00> : vector<1xf32>
    %29 = vector.multi_reduction <add>, %28, %cst_11 [0] : vector<48x1xf32> to vector<1xf32>
    %30 = vector.shape_cast %29 : vector<1xf32> to vector<1x1xf32>
    %cst_12 = arith.constant dense<0.000000e+00> : vector<1xf32>
    %31 = vector.multi_reduction <add>, %26, %cst_12 [0] : vector<48x1xf32> to vector<1xf32>
    %32 = vector.shape_cast %31 : vector<1xf32> to vector<1x1xf32>
    %33 = vector.shape_cast %30 : vector<1x1xf32> to vector<1x1x1xf32>
    %34 = vector.shape_cast %33 : vector<1x1x1xf32> to vector<1x1x1xf32>
    %35 = vector.broadcast %34 : vector<1x1x1xf32> to vector<1x1x128xf32>
    %c0_13 = arith.constant 0 : index
    %c0_14 = arith.constant 0 : index
    %c0_15 = arith.constant 0 : index
    %36 = vector.load %arg5[%c0_13, %c0_14, %c0_15] : memref<1x1x128xf32, #tpu.memory_space<vmem>>, vector<1x1x128xf32>
    tpu.vector_store %arg5[%c0_13, %c0_14, %c0_15], %35 {strides = array<i32>} : memref<1x1x128xf32, #tpu.memory_space<vmem>>, vector<1x1x128xf32>,
    %37 = vector.shape_cast %32 : vector<1x1xf32> to vector<1x1x1xf32>
    %38 = vector.shape_cast %37 : vector<1x1x1xf32> to vector<1x1x1xf32>
    %39 = vector.broadcast %38 : vector<1x1x1xf32> to vector<1x1x128xf32>
    %c0_16 = arith.constant 0 : index
    %c0_17 = arith.constant 0 : index
    %c0_18 = arith.constant 0 : index
    %40 = vector.load %arg6[%c0_16, %c0_17, %c0_18] : memref<1x1x128xf32, #tpu.memory_space<vmem>>, vector<1x1x128xf32>
    tpu.vector_store %arg6[%c0_16, %c0_17, %c0_18], %39 {strides = array<i32>} : memref<1x1x128xf32, #tpu.memory_space<vmem>>, vector<1x1x128xf32>,
    %41 = vector.broadcast %7 : vector<48x1xf32> to vector<48x48xf32>
    %42 = arith.cmpf oeq, %5, %41 : vector<48x48xf32>
    %c48_i32 = arith.constant 48 : i32
    %43 = vector.broadcast %c48_i32 : i32 to vector<48x48xi32>
    %44 = arith.select %42, %16, %43 : vector<48x48xi1>, vector<48x48xi32>
    %cst_19 = arith.constant dense<2147483647> : vector<48xi32>
    %45 = vector.multi_reduction <minsi>, %44, %cst_19 [1] : vector<48x48xi32> to vector<48xi32>
    %46 = vector.shape_cast %45 : vector<48xi32> to vector<48x1xi32>
    %c0_20 = arith.constant 0 : index
    %c0_21 = arith.constant 0 : index
    %47 = vector.load %arg7[%c0_20, %c0_21] : memref<48x1xi32, #tpu.memory_space<vmem>>, vector<48x1xi32>
    tpu.vector_store %arg7[%c0_20, %c0_21], %46 {strides = array<i32>} : memref<48x1xi32, #tpu.memory_space<vmem>>, vector<48x1xi32>,
    return
  }
  func.func @transform_0(%arg0: i32) -> (i32, i32) {
    %c0_i32 = arith.constant 0 : i32
    %c0_i32_0 = arith.constant 0 : i32
    return %arg0, %c0_i32 : i32, i32
  }
  func.func @transform_1(%arg0: i32) -> (i32, i32) {
    %c0_i32 = arith.constant 0 : i32
    %c0_i32_0 = arith.constant 0 : i32
    %c0_i32_1 = arith.constant 0 : i32
    return %c0_i32, %c0_i32_0 : i32, i32
  }
  func.func @transform_2(%arg0: i32) -> (i32, i32) {
    %c0_i32 = arith.constant 0 : i32
    %c0_i32_0 = arith.constant 0 : i32
    %c0_i32_1 = arith.constant 0 : i32
    return %c0_i32, %c0_i32_0 : i32, i32
  }
  func.func @transform_3(%arg0: i32) -> (i32, i32) {
    %c0_i32 = arith.constant 0 : i32
    %c0_i32_0 = arith.constant 0 : i32
    return %arg0, %c0_i32 : i32, i32
  }
  func.func @transform_4(%arg0: i32) -> (i32, i32, i32) {
    %c0_i32 = arith.constant 0 : i32
    %c0_i32_0 = arith.constant 0 : i32
    %c0_i32_1 = arith.constant 0 : i32
    return %arg0, %c0_i32, %c0_i32_0 : i32, i32, i32
  }
  func.func @transform_5(%arg0: i32) -> (i32, i32, i32) {
    %c0_i32 = arith.constant 0 : i32
    %c0_i32_0 = arith.constant 0 : i32
    %c0_i32_1 = arith.constant 0 : i32
    return %arg0, %c0_i32, %c0_i32_0 : i32, i32, i32
  }
  func.func @transform_6(%arg0: i32) -> (i32, i32) {
    %c0_i32 = arith.constant 0 : i32
    %c0_i32_0 = arith.constant 0 : i32
    return %arg0, %c0_i32 : i32, i32
  }
}

</mosaic_0001>

<bundles_post_ra>
// kernel: tpu_custom_call.1
= control target key start
LH: loop header
LB: loop body
LE: loop exit
PB: predicated region body
PF: predicated region fallthrough
CT: control target
= control target key end

     0   :  { %12 = vsyncpa [#allocation3], 0  ;;  %v600_v1 = vmov 0.0   ;;  %vm601_vm0 = vmmov 0   ;;  %s933_s0 = inlined_call_operand.vmem [shape: bf16[48,32], index: 0, kind: input, shape index: {}]   ;;  %s934_s1 = inlined_call_operand.vmem [shape: bf16[32,48], index: 1, kind: input, shape index: {}]   ;;  %s935_s2 = inlined_call_operand.vmem [shape: f32[1,48], index: 2, kind: input, shape index: {}]   ;;  %s936_s3 = inlined_call_operand.vmem [shape: s32[48,1], index: 3, kind: input, shape index: {}]   ;;  %s937_s4 = inlined_call_operand.hbm [shape: f32[1,1,128], index: 4, kind: output, shape index: {0}]   ;;  %s938_s5 = inlined_call_operand.hbm [shape: f32[1,1,128], index: 5, kind: output, shape index: {1}]   ;;  %s939_s6 = inlined_call_operand.vmem [shape: s32[48,1], index: 6, kind: output, shape index: {2}]  }
   0x1   :  { %v527_v0 = vld [vmem:[%s934_s1 + $0x8] sm:$0xff]   ;;  %500 = vmatprep.subr.bf16.mxu0 %v600_v1  ;;  %516 = vmatprep.subr.bf16.mxu1 %v600_v1  ;;  %v528_v2 = vld [vmem:[%s934_s1] sm:$0xff]  }
   0x2   :  { %501 = vmatpush3.bf16.msra.mxu0 %v527_v0  ;;  %518 = vmatpush3.bf16.msra.mxu1 %v527_v0  ;;  %v529_v3 = vld [vmem:[%s933_s0] sm:$0xff]   ;;  %v530_v4 = vld [vmem:[%s933_s0 + $0x8] sm:$0xff]  }
   0x3   :  { %502 = vmatprep.subr.bf16.mxu0 %v600_v1  ;;  %517 = vmatprep.subr.bf16.mxu1 %v600_v1 }
   0x4   :  { %504 = vmatprep.mubr.msk.bf16.mxu0 %vm601_vm0, %v600_v1  ;;  %508 = vmatprep.mubr.msk.bf16.mxu1 %vm601_vm0, %v600_v1 }
   0x5   :  { %13 = vsyncpa [#allocation5], 0  ;;  %vm67_vm1 = vcmask 261120   ;;  %v531_v5 = vld [vmem:[%s933_s0 + $0x10] sm:$0xff]   ;;  %v602_v6 = vmov 0   ;;  %vm134_vm2 = vcmask 392192   ;;  %v213_v54 = vlaneseq }
   0x6   :  { %503 = vmatpush3.bf16.msra.mxu0 %v528_v2  ;;  %519 = vmatpush3.bf16.msra.mxu1 %v528_v2  ;;  %v480_v7 = vld [vmem:[%s935_s2] ss:$0 sm:$0xff]  ;;  %v688_v30 = vld [vmem:[%s936_s3 + $0x8] sm:$0xff]  ;;  %v694_v31 = vld [vmem:[%s936_s3 + $0x10] sm:$0xff]  ;;  %s603_s23 = smov [#allocation2]  }
   0x7   :  { %526 = vset.pattern.permute.xlu1 %v602_v6  ;;  %525 = vset.pattern.permute.xlu0 %v602_v6  ;;  %v700_v32 = vld [vmem:[%s936_s3] sm:$0xff]  ;;  %v710_v35 = vld [vmem:[%s936_s3 + $0x18] sm:$0xff]  ;;  %v722_v37 = vld [vmem:[%s936_s3 + $0x28] sm:$0xff]  ;;  %v746_v60 = vand.u32 127, %v213_v54  ;;  %s454_s24 = sshll.u32 %s603_s23, 4  ;;  %s455_s24 = int_to_ptr.vmem [resolvable:$true] %s454_s24 }
   0x8   :  { %v716_v36 = vld [vmem:[%s936_s3 + $0x20] sm:$0xff]  ;;  %vm263_vm15 = vcmp.ne.s32.totalorder %v700_v32, 4294967196  ;;  %s556_s27 = scalar_lea.vmem %s455_s24, 16  ;;  %s560_s28 = scalar_lea.vmem %s455_s24, 32 }
   0x9   :  { %505 = vmatmul.mubr.msk.bf16.vlgmr.msra.gmra.mxu0 %vm67_vm1, %v529_v3  ;;  %509 = vmatmul.mubr.msk.bf16.vlgmr.msra.gmra.mxu1 %vm67_vm1, %v530_v4  ;;  %p557_p0 = scmp.ne.s32.totalorder %s455_s24, %s556_s27  ;;  %p561_p1 = scmp.lt.s32.totalorder %s455_s24, %s455_s24 }
   0xa   :  { %512 = vmatprep.mubr.msk.bf16.mxu1 %vm601_vm0, %v600_v1  ;;  %vm264_vm0 = vcmp.ne.s32.totalorder %v688_v30, 4294967196  ;;  %p562_p2 = scmp.lt.s32.totalorder %s560_s28, %s556_s27 }
   0xc   :  { %p563_p3 = por %p562_p2, %p561_p1 }
   0xe   :  { %p564_p4 = pnand %p563_p3, %p557_p0 }
  0x11   :  { %513 = vmatmul.mubr.msk.bf16.gmra.mxu1 %vm67_vm1, %v531_v5  ;;  %vm265_vm1 = vcmp.ne.s32.totalorder %v694_v31, 4294967196 }
  0xc9   :  { %v111_v8 = vpop.f32.mrf.mxu0  ;;  %v119_v9 = vpop.f32.mrf.mxu1 }
  0xca   :  { %v665_v10 = vadd.f32 %v480_v7, %v111_v8  ;;  %v667_v11 = vadd.f32 %v480_v7, %v119_v9 }
  0xcb   :  { %v506_v12 = vpop.f32.mrf.mxu0  ;;  %v510_v13 = vpop.f32.mrf.mxu1 }
  0xcc   :  { %v141_v14 = vsel %vm134_vm2, %v667_v11, -inf  ;;  %v135_v15 = vsel %vm134_vm2, %v665_v10, -inf }
  0xcd   :  { %142 = vmax.xlane.f32.xlu1 %v141_v14  ;;  %v122_v16 = vpop.f32.mrf.mxu1  ;;  %136 = vmax.xlane.f32.xlu0 %v135_v15  ;;  %v114_v17 = vpop.f32.mrf.mxu0 }
  0xce   :  { %v673_v18 = vadd.f32 %v480_v7, %v122_v16  ;;  %v675_v19 = vadd.f32 %v480_v7, %v114_v17 }
  0xcf   :  { %v511_v20 = vpop.f32.mrf.mxu1  ;;  %v507_v21 = vpop.f32.mrf.mxu0 }
  0xd0   :  { %v144_v22 = vsel %vm134_vm2, %v673_v18, -inf  ;;  %v138_v23 = vsel %vm134_vm2, %v675_v19, -inf }
  0xd1   :  { %145 = vmax.xlane.f32.xlu1 %v144_v22  ;;  %v127_v24 = vpop.f32.mrf.mxu1  ;;  %139 = vmax.xlane.f32.xlu0 %v138_v23 }
  0xd2   :  { %v681_v25 = vadd.f32 %v480_v7, %v127_v24 }
  0xd3   :  { %v514_v26 = vpop.f32.mrf.mxu1 }
  0xd4   :  { %v147_v27 = vsel %vm134_vm2, %v681_v25, -inf }
  0xd5   :  { %148 = vmax.xlane.f32.xlu0 %v147_v27  ;;  %v130_v28 = vpop.f32.mrf.mxu1 }
  0xd6   :  { %v703_v33 = vadd.f32 %v480_v7, %v130_v28 }
  0xd7   :  { %v515_v29 = vpop.f32.mrf.mxu1 }
  0xd8   :  { %v150_v34 = vsel %vm134_vm2, %v703_v33, -inf }
  0xe2   :  { %219 = vperm.xlu1 %526, %v688_v30  }
  0xe6   :  { %222 = vperm.xlu1 %526, %v694_v31  }
  0xeb   :  { %216 = vperm.xlu0 %525, %v700_v32  }
 0x10a   :  { %151 = vmax.xlane.f32.xlu1 %v150_v34 }
 0x11b   :  { %225 = vperm.xlu1 %526, %v710_v35  }
 0x11f   :  { %228 = vperm.xlu1 %526, %v716_v36  }
 0x123   :  { %231 = vperm.xlu1 %526, %v722_v37  }
 0x156   :  { %v725_v38 = vpop.xlane.xlu1 %142  ;;  %v727_v39 = vpop.xlane.xlu0 %136 }
 0x157   :  { %v155_v40 = vsub.f32 %v667_v11, %v725_v38  ;;  %v153_v41 = vsub.f32 %v665_v10, %v727_v39  ;;  %vm340_vm5 = vcmp.eq.f32.partialorder %v665_v10, %v727_v39  ;;  %vm342_vm6 = vcmp.eq.f32.partialorder %v667_v11, %v725_v38 }
 0x158   :  { %v346_v15 = vsel %vm340_vm5, %v746_v60, 48  ;;  %v348_v20 = vsel %vm342_vm6, %v746_v60, 48  ;;  %vm267_vm6 = vcmp.ne.s32.totalorder %v716_v36, 4294967196 }
 0x159   :  { %v159_v42 = vmul.f32 1.442695, %v153_v41  ;;  %v163_v43 = vmul.f32 1.442695, %v155_v40  ;;  %v768_v16 = vsel %vm134_vm2, %v346_v15, 2147483647 }
 0x15a   :  { %v733_v44 = vpop.xlane.xlu1 %145  ;;  %v735_v45 = vpop.xlane.xlu0 %139  ;;  %v354_v21 = vshra.s32 %v768_v16, 16 }
 0x15b   :  { %v156_v46 = vsub.f32 %v673_v18, %v733_v44  ;;  %v154_v47 = vsub.f32 %v675_v19, %v735_v45  ;;  %532 = vpow2.f32 %v159_v42  ;;  %vm341_vm10 = vcmp.eq.f32.partialorder %v675_v19, %v735_v45 }
 0x15c   :  { %534 = vpow2.f32 %v163_v43  ;;  %v781_v24 = vcvt.s32.f32 %v354_v21  ;;  %vm343_vm12 = vcmp.eq.f32.partialorder %v673_v18, %v733_v44 }
 0x15d   :  { %v161_v48 = vmul.f32 1.442695, %v154_v47  ;;  %v165_v49 = vmul.f32 1.442695, %v156_v46  ;;  %v347_v47 = vsel %vm341_vm10, %v746_v60, 48 }
 0x15e   :  { %v741_v50 = vpop.xlane.xlu0 %148  ;;  %v220_v57 = vpop.permute.xlu1 %219 }
 0x15f   :  { %v157_v51 = vsub.f32 %v681_v25, %v741_v50  ;;  %536 = vpow2.f32 %v161_v48  ;;  %vm344_vm7 = vcmp.eq.f32.partialorder %v681_v25, %v741_v50  ;;  %vm234_vm9 = vcmp.eq.s32.totalorder %v746_v60, %v220_v57 }
 0x160   :  { %538 = vpow2.f32 %v165_v49  ;;  %v350_v23 = vsel %vm344_vm7, %v746_v60, 48  ;;  %v240_v40 = vsel %vm234_vm9, %v675_v19, 0.0  ;;  %v809_v48 = vsel %vm134_vm2, %v347_v47, 2147483647 }
 0x161   :  { %v167_v52 = vmul.f32 1.442695, %v157_v51  ;;  %v785_v27 = vsel %vm134_vm2, %v350_v23, 2147483647  ;;  %v248_v43 = vsel %vm134_vm2, %v240_v40, 0.0  ;;  %v349_v51 = vsel %vm343_vm12, %v746_v60, 48 }
 0x162   :  { %v223_v2 = vpop.permute.xlu1 %222  ;;  %v414_v29 = vshra.s32 %v785_v27, 16  ;;  %v491_v23 = vsel %vm265_vm1, 1.0, %v600_v1 }
 0x163   :  { %540 = vpow2.f32 %v167_v52  ;;  %vm235_vm4 = vcmp.eq.s32.totalorder %v746_v60, %v223_v2  ;;  %v369_v52 = vshra.s32 %v809_v48, 16 }
 0x164   :  { %v241_v7 = vsel %vm235_vm4, %v667_v11, 0.0  ;;  %v778_v11 = vsel %vm134_vm2, %v348_v20, 2147483647  ;;  %v798_v42 = vcvt.s32.f32 %v414_v29  ;;  %v490_v20 = vsel %vm264_vm0, 1.0, %v600_v1 }
 0x165   :  { %v251_v8 = vsel %vm134_vm2, %v241_v7, 0.0  ;;  %v384_v26 = vshra.s32 %v778_v11, 16  ;;  %v383_v32 = vand.u32 65535, %v778_v11  ;;  %vm266_vm4 = vcmp.ne.s32.totalorder %v710_v35, 4294967196 }
 0x166   :  { %v217_v59 = vpop.permute.xlu0 %216  ;;  %v492_v47 = vsel %vm266_vm4, 1.0, %v600_v1 }
 0x167   :  { %vm233_vm3 = vcmp.eq.s32.totalorder %v746_v60, %v217_v59  ;;  %v789_v28 = vcvt.s32.f32 %v384_v26 }
 0x168   :  { %v533_v53 = vpop.eup %532  ;;  %v239_v5 = vsel %vm233_vm3, %v665_v10, 0.0 }
 0x169   :  { %v171_v55 = vsel %vm134_vm2, %v533_v53, 0.0  ;;  %v535_v56 = vpop.eup %534  ;;  %v245_v6 = vsel %vm134_vm2, %v239_v5, 0.0 }
 0x16a   :  { %172 = vadd.xlane.f32.xlu1 %v171_v55  ;;  %v177_v61 = vsel %vm134_vm2, %v535_v56, 0.0  ;;  %v821_v55 = vcvt.s32.f32 %v369_v52 }
 0x16c   :  { %v537_v58 = vpop.eup %536 }
 0x16d   :  { %v174_v62 = vsel %vm134_vm2, %v537_v58, 0.0  ;;  %v539_v63 = vpop.eup %538 }
 0x16e   :  { %178 = vadd.xlane.f32.xlu1 %v177_v61  ;;  %175 = vadd.xlane.f32.xlu0 %v174_v62  ;;  %v180_v4 = vsel %vm134_vm2, %v539_v63, 0.0 }
 0x170   :  { %v541_v0 = vpop.eup %540 }
 0x171   :  { %v183_v3 = vsel %vm134_vm2, %v541_v0, 0.0 }
 0x172   :  { %181 = vadd.xlane.f32.xlu1 %v180_v4  ;;  %184 = vadd.xlane.f32.xlu0 %v183_v3 }
 0x176   :  { %246 = vadd.xlane.f32.xlu0 %v245_v6  ;;  %v353_v6 = vand.u32 65535, %v768_v16 }
 0x17a   :  { %252 = vadd.xlane.f32.xlu0 %v251_v8 }
 0x193   :  { %v758_v9 = vpop.xlane.xlu1 %151 }
 0x194   :  { %v158_v12 = vsub.f32 %v703_v33, %v758_v9  ;;  %vm345_vm14 = vcmp.eq.f32.partialorder %v703_v33, %v758_v9 }
 0x195   :  { %v351_v54 = vsel %vm345_vm14, %v746_v60, 48 }
 0x196   :  { %v169_v13 = vmul.f32 1.442695, %v158_v12  ;;  %v825_v57 = vsel %vm134_vm2, %v351_v54, 2147483647  ;;  %v489_v12 = vsel %vm263_vm15, 1.0, %v600_v1 }
 0x197   :  { %v226_v14 = vpop.permute.xlu1 %225  ;;  %v429_v58 = vshra.s32 %v825_v57, 16 }
 0x198   :  { %542 = vpow2.f32 %v169_v13  ;;  %vm236_vm11 = vcmp.eq.s32.totalorder %v746_v60, %v226_v14 }
 0x199   :  { %v242_v46 = vsel %vm236_vm11, %v673_v18, 0.0  ;;  %v818_v18 = vsel %vm134_vm2, %v349_v51, 2147483647  ;;  %v832_v59 = vcvt.s32.f32 %v429_v58 }
 0x19a   :  { %v254_v19 = vsel %vm134_vm2, %v242_v46, 0.0  ;;  %v399_v56 = vshra.s32 %v818_v18, 16 }
 0x19b   :  { %v229_v17 = vpop.permute.xlu1 %228 }
 0x19c   :  { %vm237_vm8 = vcmp.eq.s32.totalorder %v746_v60, %v229_v17  ;;  %v355_v17 = vcvt.s32.f32 %v353_v6 }
 0x19d   :  { %v243_v10 = vsel %vm237_vm8, %v681_v25, 0.0  ;;  %vm268_vm8 = vcmp.ne.s32.totalorder %v722_v37, 4294967196  ;;  %v368_v37 = vand.u32 65535, %v809_v48 }
 0x19e   :  { %v257_v22 = vsel %vm134_vm2, %v243_v10, 0.0 }
 0x19f   :  { %258 = vadd.xlane.f32.xlu0 %v257_v22  ;;  %v232_v41 = vpop.permute.xlu1 %231 }
 0x1a0   :  { %vm238_vm13 = vcmp.eq.s32.totalorder %v746_v60, %v232_v41 }
 0x1a1   :  { %v244_v49 = vsel %vm238_vm13, %v703_v33, 0.0  ;;  %v828_v33 = vcvt.s32.f32 %v399_v56  ;;  %v493_v56 = vsel %vm267_vm6, 1.0, %v600_v1 }
 0x1a2   :  { %v260_v53 = vsel %vm134_vm2, %v244_v49, 0.0 }
 0x1a3   :  { %357 = vmin.xlane.f32.xlu0 %v781_v24 }
 0x1a5   :  { %v543_v25 = vpop.eup %542 }
 0x1a6   :  { %v186_v34 = vsel %vm134_vm2, %v543_v25, 0.0  ;;  %vm293_vm2 = vcmask 7168  }
 0x1a7   :  { %187 = vadd.xlane.f32.xlu1 %v186_v34  ;;  %387 = vmin.xlane.f32.xlu0 %v789_v28  ;;  %v311_v14 = vsel %vm293_vm2, %v489_v12, 0.0  ;;  %v312_v10 = vsel %vm293_vm2, %v490_v20, 0.0  ;;  %v314_v26 = vsel %vm293_vm2, %v491_v23, 0.0  ;;  %v316_v52 = vsel %vm293_vm2, %v492_v47, 0.0 }
 0x1a8   :  { %v313_v34 = vadd.f32 %v312_v10, %v311_v14  ;;  %v370_v10 = vcvt.s32.f32 %v368_v37 }
 0x1aa   :  { %v315_v51 = vadd.f32 %v314_v26, %v313_v34 }
 0x1ab   :  { %249 = vadd.xlane.f32.xlu1 %v248_v43  ;;  %417 = vmin.xlane.f32.xlu0 %v798_v42 }
 0x1af   :  { %255 = vadd.xlane.f32.xlu1 %v254_v19 }
 0x1b3   :  { %261 = vadd.xlane.f32.xlu1 %v260_v53 }
 0x1b7   :  { %372 = vmin.xlane.f32.xlu1 %v821_v55 }
 0x1bb   :  { %402 = vmin.xlane.f32.xlu1 %v828_v33 }
 0x1bf   :  { %432 = vmin.xlane.f32.xlu1 %v832_v59 }
 0x1f3   :  { %v173_v61 = vpop.xlane.xlu1 %172 }
 0x1f4   :  { %544 = vlog2.f32 %v173_v61  ;;  %v317_v61 = vadd.f32 %v316_v52, %v315_v51 }
 0x1f7   :  { %v176_v60 = vpop.xlane.xlu0 %175  ;;  %v179_v63 = vpop.xlane.xlu1 %178 }
 0x1f8   :  { %546 = vlog2.f32 %v179_v63 }
 0x1f9   :  { %548 = vlog2.f32 %v176_v60  ;;  %v318_v60 = vsel %vm293_vm2, %v493_v56, 0.0 }
 0x1fb   :  { %v185_v62 = vpop.xlane.xlu0 %184  ;;  %v182_v2 = vpop.xlane.xlu1 %181 }
 0x1fc   :  { %550 = vlog2.f32 %v182_v2 }
 0x1fd   :  { %552 = vlog2.f32 %v185_v62 }
 0x1ff   :  { %v247_v0 = vpop.xlane.xlu0 %246 }
 0x201   :  { %v545_v4 = vpop.eup %544 }
 0x202   :  { %v190_v7 = vmul.f32 0.6931472, %v545_v4 }
 0x203   :  { %v835_v3 = vpop.xlane.xlu0 %252 }
 0x204   :  { %v201_v30 = vadd.f32 %v190_v7, %v727_v39  ;;  %v385_v39 = vcvt.s32.f32 %v383_v32  ;;  %v494_v7 = vsel %vm268_vm8, 1.0, %v600_v1  ;;  %v398_v1 = vand.u32 65535, %v818_v18 }
 0x205   :  { %v547_v8 = vpop.eup %546  ;;  %v320_v14 = vsel %vm293_vm2, %v494_v7, 0.0 }
 0x206   :  { %v549_v13 = vpop.eup %548  ;;  %v194_v16 = vmul.f32 0.6931472, %v547_v8  ;;  %v281_v40 = vsub.f32 %v201_v30, %v247_v0  ;;  %v319_v8 = vadd.f32 %v318_v60, %v317_v61 }
 0x207   :  { %v192_v22 = vmul.f32 0.6931472, %v549_v13 }
 0x208   :  { %v203_v41 = vadd.f32 %v194_v16, %v725_v38  ;;  %v321_v30 = vadd.f32 %v320_v14, %v319_v8 }
 0x209   :  { %v551_v11 = vpop.eup %550  ;;  %v202_v46 = vadd.f32 %v192_v22, %v735_v45 }
 0x20a   :  { %v196_v43 = vmul.f32 0.6931472, %v551_v11  ;;  %v553_v19 = vpop.eup %552  ;;  %v283_v53 = vsub.f32 %v203_v41, %v835_v3  ;;  %v322_v11 = vrot.slane %v321_v30, 4 }
 0x20b   :  { %v198_v35 = vmul.f32 0.6931472, %v553_v19 }
 0x20c   :  { %v204_v36 = vadd.f32 %v196_v43, %v733_v44  ;;  %v289_v0 = vmul.f32 %v491_v23, %v283_v53 }
 0x20d   :  { %v205_v4 = vadd.f32 %v198_v35, %v741_v50 }
 0x228   :  { %v838_v5 = vpop.xlane.xlu0 %258 }
 0x229   :  { %v285_v13 = vsub.f32 %v205_v4, %v838_v5 }
 0x22c   :  { %v845_v15 = vpop.xlane.xlu0 %357 }
 0x22d   :  { %vm359_vm3 = vcmp.eq.f32.partialorder %v781_v24, %v845_v15  ;;  %v413_v24 = vand.u32 65535, %v785_v27 }
 0x22e   :  { %v360_v21 = vsel %vm359_vm3, %v355_v17, inf }
 0x22f   :  { %361 = vmin.xlane.f32.xlu0 %v360_v21  ;;  %v415_v38 = vcvt.s32.f32 %v413_v24  ;;  %v291_v21 = vmul.f32 %v493_v56, %v285_v13 }
 0x230   :  { %v188_v25 = vpop.xlane.xlu1 %187  ;;  %v858_v29 = vpop.xlane.xlu0 %387 }
 0x231   :  { %554 = vlog2.f32 %v188_v25  ;;  %vm389_vm5 = vcmp.eq.f32.partialorder %v789_v28, %v858_v29  ;;  %v287_v28 = vmul.f32 %v489_v12, %v281_v40  ;;  %v297_v12 = vsel %vm293_vm2, %v289_v0, 0.0 }
 0x232   :  { %v390_v31 = vsel %vm389_vm5, %v385_v39, inf  ;;  %v400_v25 = vcvt.s32.f32 %v398_v1  ;;  %v428_v39 = vand.u32 65535, %v825_v57  ;;  %v301_v34 = vsel %vm293_vm2, %v291_v21, 0.0 }
 0x233   :  { %391 = vmin.xlane.f32.xlu0 %v390_v31  ;;  %v294_v63 = vsel %vm293_vm2, %v287_v28, 0.0 }
 0x234   :  { %v250_v27 = vpop.xlane.xlu1 %249  ;;  %v869_v49 = vpop.xlane.xlu0 %417  ;;  %v430_v43 = vcvt.s32.f32 %v428_v39 }
 0x235   :  { %v282_v54 = vsub.f32 %v202_v46, %v250_v27  ;;  %vm419_vm7 = vcmp.eq.f32.partialorder %v798_v42, %v869_v49  ;;  %v424_v61 = vcvt.f32.s32 %v869_v49 }
 0x236   :  { %v420_v45 = vsel %vm419_vm7, %v415_v38, inf }
 0x237   :  { %v288_v58 = vmul.f32 %v490_v20, %v282_v54  ;;  %421 = vmin.xlane.f32.xlu0 %v420_v45  ;;  %v364_v54 = vcvt.f32.s32 %v845_v15 }
 0x238   :  { %v256_v62 = vpop.xlane.xlu1 %255 }
 0x239   :  { %v295_v2 = vsel %vm293_vm2, %v288_v58, 0.0  ;;  %v284_v42 = vsub.f32 %v204_v36, %v256_v62  ;;  %v365_v35 = vshll.u32 %v364_v54, 16 }
 0x23a   :  { %v296_v3 = vadd.f32 %v295_v2, %v294_v63  ;;  %v425_v2 = vshll.u32 %v424_v61, 16 }
 0x23b   :  { %v290_v6 = vmul.f32 %v492_v47, %v284_v42 }
 0x23c   :  { %v262_v44 = vpop.xlane.xlu1 %261  ;;  %v298_v32 = vadd.f32 %v297_v12, %v296_v3 }
 0x23d   :  { %v299_v16 = vsel %vm293_vm2, %v290_v6, 0.0 }
 0x23e   :  { %v555_v17 = vpop.eup %554  ;;  %v300_v48 = vadd.f32 %v299_v16, %v298_v32 }
 0x23f   :  { %v200_v20 = vmul.f32 0.6931472, %v555_v17 }
 0x240   :  { %v373_v50 = vpop.xlane.xlu1 %372  ;;  %v302_v18 = vadd.f32 %v301_v34, %v300_v48 }
 0x241   :  { %v206_v22 = vadd.f32 %v200_v20, %v758_v9  ;;  %vm374_vm9 = vcmp.eq.f32.partialorder %v821_v55, %v373_v50  ;;  %v323_v55 = vadd.f32 %v322_v11, %v321_v30  ;;  %v379_v49 = vcvt.f32.s32 %v373_v50 }
 0x242   :  { %v375_v23 = vsel %vm374_vm9, %v370_v10, inf }
 0x243   :  { %v286_v5 = vsub.f32 %v206_v22, %v262_v44  ;;  %376 = vmin.xlane.f32.xlu1 %v375_v23  ;;  %v324_v19 = vrot.slane %v323_v55, 2  ;;  %v380_v3 = vshll.u32 %v379_v49, 16 }
 0x244   :  { %v403_v26 = vpop.xlane.xlu1 %402 }
 0x245   :  { %v292_v24 = vmul.f32 %v494_v7, %v286_v5  ;;  %vm404_vm10 = vcmp.eq.f32.partialorder %v828_v33, %v403_v26  ;;  %v325_v38 = vadd.f32 %v324_v19, %v323_v55  ;;  %v409_v4 = vcvt.f32.s32 %v403_v26 }
 0x246   :  { %v405_v40 = vsel %vm404_vm10, %v400_v25, inf }
 0x247   :  { %v303_v9 = vsel %vm293_vm2, %v292_v24, 0.0  ;;  %406 = vmin.xlane.f32.xlu1 %v405_v40  ;;  %v326_v28 = vrot.slane %v325_v38, 1  ;;  %v410_v44 = vshll.u32 %v409_v4, 16 }
 0x248   :  { %v304_v41 = vadd.f32 %v303_v9, %v302_v18  ;;  %v895_v31 = vpop.xlane.xlu1 %432 }
 0x249   :  { %vm434_vm11 = vcmp.eq.f32.partialorder %v832_v59, %v895_v31  ;;  %v327_v53 = vadd.f32 %v326_v28, %v325_v38  ;;  %v394_v59 = vcvt.f32.s32 %v858_v29  ;;  %v439_v37 = vcvt.f32.s32 %v895_v31 }
 0x24a   :  { %v305_v46 = vrot.slane %v304_v41, 4  ;;  %v435_v57 = vsel %vm434_vm11, %v430_v43, inf }
 0x24b   :  { %436 = vmin.xlane.f32.xlu1 %v435_v57  ;;  %v395_v60 = vshll.u32 %v394_v59, 16 }
 0x24c   :  { %v306_v47 = vadd.f32 %v305_v46, %v304_v41 }
 0x24e   :  { %v307_v27 = vrot.slane %v306_v47, 2 }
 0x250   :  { %v308_v33 = vadd.f32 %v307_v27, %v306_v47 }
 0x252   :  { %v309_v51 = vrot.slane %v308_v33, 1 }
 0x254   :  { %v310_v52 = vadd.f32 %v309_v51, %v308_v33 }
 0x256   :  { %330 = vperm.xlu0 %525, %v310_v52  }
 0x25c   :  { %336 = vperm.xlu1 %526, %v327_v53  }
 0x2b8   :  { %v362_v45 = vpop.xlane.xlu0 %361 }
 0x2b9   :  { %v363_v56 = vcvt.f32.s32 %v362_v45 }
 0x2bb   :  { %v366_v58 = vadd.s32 %v365_v35, %v363_v56 }
 0x2bc   :  { %v392_v36 = vpop.xlane.xlu0 %391 }
 0x2bd   :  { %442 = vst.msk [vmem:[%s939_s6] sm:$0xff] %vm293_vm2, %v366_v58  ;;  %v393_v62 = vcvt.f32.s32 %v392_v36 }
 0x2bf   :  { %v396_v63 = vadd.s32 %v395_v60, %v393_v62 }
 0x2c0   :  { %v422_v0 = vpop.xlane.xlu0 %421 }
 0x2c1   :  { %444 = vst.msk [vmem:[%s939_s6 + $0x10] sm:$0xff] %vm293_vm2, %v396_v63  ;;  %v423_v15 = vcvt.f32.s32 %v422_v0 }
 0x2c3   :  { %v426_v29 = vadd.s32 %v425_v2, %v423_v15 }
 0x2c5   :  { %446 = vst.msk [vmem:[%s939_s6 + $0x20] sm:$0xff] %vm293_vm2, %v426_v29 }
 0x2cc   :  { %v377_v42 = vpop.xlane.xlu1 %376 }
 0x2cd   :  { %v378_v6 = vcvt.f32.s32 %v377_v42 }
 0x2cf   :  { %v381_v7 = vadd.s32 %v380_v3, %v378_v6 }
 0x2d0   :  { %v407_v8 = vpop.xlane.xlu1 %406 }
 0x2d1   :  { %443 = vst.msk [vmem:[%s939_s6 + $0x8] sm:$0xff] %vm293_vm2, %v381_v7  ;;  %v408_v12 = vcvt.f32.s32 %v407_v8  ;;  %v331_v13 = vpop.permute.xlu0 %330 }
 0x2d2   :  { %333 = vst [vmem:[#allocation2] sm:$0x1] %v331_v13 }
 0x2d3   :  { %v411_v14 = vadd.s32 %v410_v44, %v408_v12 }
 0x2d4   :  { %567 = shalt.err (!%p564_p4)
}
 0x2d5   :  { %457 = dma.vmem_to_hbm [thread:$0]  %s455_s24, 16, %s937_s4, [#allocation3]   ;;  %v437_v17 = vpop.xlane.xlu1 %436  ;;  %v440_v32 = vshll.u32 %v439_v37, 16  ;;  %445 = vst.msk [vmem:[%s939_s6 + $0x18] sm:$0xff] %vm293_vm2, %v411_v14 }
 0x2d6   :  { %s604_s30 = smov [#allocation4]   ;;  %v438_v20 = vcvt.f32.s32 %v437_v17 }
 0x2d7   :  { %s464_s7 = sshll.u32 %s604_s30, 4  ;;  %s465_s7 = int_to_ptr.vmem [resolvable:$true] %s464_s7 }
 0x2d8   :  { %v441_v16 = vadd.s32 %v440_v32, %v438_v20  ;;  %s576_s4 = scalar_lea.vmem %s465_s7, 16  ;;  %s580_s10 = scalar_lea.vmem %s465_s7, 32 }
 0x2d9   :  { %v337_v30 = vpop.permute.xlu1 %336  ;;  %p577_p5 = scmp.ne.s32.totalorder %s465_s7, %s576_s4  ;;  %p581_p6 = scmp.lt.s32.totalorder %s465_s7, %s465_s7 }
 0x2da   :  { %447 = vst.msk [vmem:[%s939_s6 + $0x28] sm:$0xff] %vm293_vm2, %v441_v16  ;;  %339 = vst [vmem:[#allocation4] sm:$0x1] %v337_v30  ;;  %p582_p7 = scmp.lt.s32.totalorder %s580_s10, %s576_s4 }
 0x2dc   :  { %p583_p8 = por %p582_p7, %p581_p6 }
 0x2de   :  { %p584_p9 = pnand %p583_p8, %p577_p5 }
 0x2e0   :  { %587 = shalt.err (!%p584_p9)
}
 0x2e1   :  { %467 = dma.vmem_to_hbm [thread:$0]  %s465_s7, 16, %s938_s5, [#allocation5]  }
 0x2e2   :  { %596 = dma.done.wait [#allocation3], 16  }
 0x2e3   :  { %597 = vsyncadd [#allocation3], 4294967280 }
 0x2e4   :  { %598 = dma.done.wait [#allocation5], 16  }
 0x2e5   :  { %599 = vsyncadd [#allocation5], 4294967280 }
 0x2e6   :  { %478 = vsyncpa [#allocation3], 1 }
 0x2e7   :  { %479 = vsyncpa [#allocation5], 1 }

</bundles_post_ra>
